<compile_context>
chip_gen: v7x
topology: tpu7x:2x2x1
jax: 0.10.0
libtpu: 0.0.40
codegen_flags: <defaults>
</compile_context>

<pallas_src>
import jax
import jax.numpy as jnp
from jax.experimental import pallas as pl
from jax.experimental.pallas import tpu as pltpu


# --------------------------------------------------------------------------- #
# Kernel
# --------------------------------------------------------------------------- #
def _tc_kernel(params_ref, x_ref, o_ref):
    # params_ref: SMEM (C+1,) f32 scalar-prefetch -> [w_eff[0..C-1], b_eff]
    # x_ref:      VMEM (TB, C, THW)
    # o_ref:      VMEM (TB, THW)
    C = x_ref.shape[1]
    acc = x_ref[:, 0, :] * params_ref[0]
    for c in range(1, C):                 # C is static & tiny -> unrolled VPU mul-adds
        acc = acc + x_ref[:, c, :] * params_ref[c]
    o_ref[...] = (acc + params_ref[C]).astype(o_ref.dtype)


# --------------------------------------------------------------------------- #
# Tile / VMEM budgeting helpers (host-side, trace time)
# --------------------------------------------------------------------------- #
def _divisors(n):
    small, large = [], []
    i = 1
    while i * i <= n:
        if n % i == 0:
            small.append(i)
            if i != n // i:
                large.append(n // i)
        i += 1
    return sorted(small + large)


def _round_up(x, m):
    return -(-x // m) * m


def _padded_block_bytes(tb, c, thw):
    """f32 VMEM bytes of one input block (TB,C,THW) and one output block (TB,THW),
    including (8,128) tile padding of the last two dims."""
    thw_p = _round_up(thw, 128)
    in_b = tb * _round_up(c, 8) * thw_p * 4        # C pads 4 -> 8 sublanes
    out_b = _round_up(tb, 8) * thw_p * 4
    return in_b, out_b


def _vmem_info():
    phys = None
    try:
        phys = getattr(pltpu.get_tpu_info(), "vmem_capacity_bytes", None)
    except Exception:
        phys = None
    if not phys:
        phys = 64 * 1024 * 1024                    # conservative (v7x per-core)
    budget = max(8 * 1024 * 1024, int(phys * 0.375))   # ~24 MiB v7x, ~48 MiB v5e/v6e
    return phys, budget


def _pick_tiles(B, C, HW, budget_bytes):
    # TB: output sublane dim must be a multiple of 8 or the full extent B.
    tb_mult8 = [d for d in _divisors(B) if d % 8 == 0 and d <= 64]
    TB = max(tb_mult8) if tb_mult8 else B

    # THW: lane dim must be a multiple of 128 or the full extent HW.
    thw_opts = sorted({d for d in _divisors(HW) if d % 128 == 0} | {HW}, reverse=True)

    target_in = 4 * 1024 * 1024                    # ~1-4 MiB blocks hit HBM roofline
    THW = None
    for t in thw_opts:                             # largest block within target+budget
        in_b, out_b = _padded_block_bytes(TB, C, t)
        if 2 * (in_b + out_b) <= budget_bytes and in_b <= target_in:
            THW = t
            break
    if THW is None:                                # relax the 4 MiB target
        for t in thw_opts:
            in_b, out_b = _padded_block_bytes(TB, C, t)
            if 2 * (in_b + out_b) <= budget_bytes:
                THW = t
                break
    if THW is None:                                # best effort: smallest legal tile
        THW = thw_opts[-1]

    # Guarantee >= 2 grid steps when possible so v7x's two TensorCores both work.
    if B // TB == 1 and HW // THW == 1:
        smaller = [t for t in thw_opts if t < THW]
        if smaller:
            THW = max(smaller)
    return TB, THW


# --------------------------------------------------------------------------- #
# Forward wrapper
# --------------------------------------------------------------------------- #
def tc_model_forward(x_nchw, w_model, b_model, w_tc, b_tc):
    """x_nchw: (B, C, H, W) float32.  Returns (B, 1, H, W) float32."""
    B, C, H, W = x_nchw.shape
    HW = H * W

    # Keep the input layout: (B, C, HW) is a free reshape (no transpose pass).
    x = x_nchw.reshape(B, C, HW)

    # Fold tc_layer (scalar affine) into the 1x1 conv:  y = wt*(w1 . x + b1) + bt
    w1 = w_model.reshape(C)
    b1 = b_model.reshape(())
    wt = w_tc.reshape(())
    bt = b_tc.reshape(())
    w_eff = wt * w1                                              # (C,)
    b_eff = wt * b1 + bt                                         # scalar
    params = jnp.concatenate([w_eff, b_eff[None]]).astype(jnp.float32)   # (C+1,)

    phys_vmem, budget = _vmem_info()
    TB, THW = _pick_tiles(B, C, HW, budget)
    grid = (B // TB, HW // THW)

    in_b, out_b = _padded_block_bytes(TB, C, THW)
    footprint = 2 * (in_b + out_b) + 4096                        # double-buffered io + slack
    vmem_limit = min(int(0.9 * phys_vmem), max(budget, footprint + (1 << 20)))

    cost = pl.CostEstimate(
        flops=2 * C * B * HW,
        bytes_accessed=(C + 1) * B * HW * 4 + (C + 1) * 4,
        transcendentals=0,
    )

    out = pl.pallas_call(
        _tc_kernel,
        out_shape=jax.ShapeDtypeStruct((B, HW), jnp.float32),
        grid_spec=pltpu.PrefetchScalarGridSpec(
            # Folded weights+bias land in SMEM once, before the grid runs.
            num_scalar_prefetch=1,
            grid=grid,
            in_specs=[
                # (TB, C, THW): last two dims are full-extent C and a 128-multiple
                # (or full-extent) spatial tile -> legal and no transpose needed.
                pl.BlockSpec((TB, C, THW), lambda i, j, p: (i, 0, j)),
            ],
            out_specs=pl.BlockSpec((TB, THW), lambda i, j, p: (i, j)),
        ),
        compiler_params=pltpu.CompilerParams(
            dimension_semantics=("parallel", "parallel"),
            vmem_limit_bytes=vmem_limit,
        ),
        cost_estimate=cost,
    )(params, x)

    return out.reshape(B, 1, H, W)


# --------------------------------------------------------------------------- #
# Self-test
# --------------------------------------------------------------------------- #
if __name__ == "__main__":
    key = jax.random.PRNGKey(0)
    k_x, k_w1, k_b1, k_wt, k_bt = jax.random.split(key, 5)

    B, C, H, W = 2, 4, 16, 16
    x = jax.random.normal(k_x, (B, C, H, W), dtype=jnp.float32)

    # Deterministic synthetic parameters (shapes match the nn.Conv2d layers).
    w_model = jax.random.normal(k_w1, (1, C, 1, 1), dtype=jnp.float32) * 0.1
    b_model = jax.random.normal(k_b1, (1,), dtype=jnp.float32) * 0.1
    w_tc    = jax.random.normal(k_wt, (1, 1, 1, 1), dtype=jnp.float32) * 0.1
    b_tc    = jax.random.normal(k_bt, (1,), dtype=jnp.float32) * 0.1

    out = tc_model_forward(x, w_model, b_model, w_tc, b_tc)
    out = jax.block_until_ready(out)

    # Pure-JAX reference (1x1 convs as einsums) for a sanity check.
    ref = jnp.einsum("oc,bchw->bohw", w_model.reshape(1, C), x) + b_model.reshape(1, 1, 1, 1)
    ref = w_tc.reshape(()) * ref + b_tc.reshape(())
    assert out.shape == (B, 1, H, W)
    assert jnp.allclose(out, ref, atol=1e-5, rtol=1e-5)

    print("KERNEL_OK")
</pallas_src>

<mosaic_0001>
module attributes {stable_mosaic.version = 11 : i64} {
  func.func @_tc_kernel(%arg0: i32, %arg1: i32, %arg2: memref<5xf32, #tpu.memory_space<smem>>, %arg3: memref<2x4x128xf32, #tpu.memory_space<vmem>>, %arg4: memref<2x128xf32, #tpu.memory_space<vmem>>) attributes {dimension_semantics = [#tpu.dimension_semantics<parallel>, #tpu.dimension_semantics<parallel>], iteration_bounds = array<i64: 1, 2>, scalar_prefetch = 1 : i64, scratch_operands = 0 : i64, tpu.core_type = #tpu.core_type<tc>, window_params = [{transform_indices = @transform_0, window_bounds = array<i64: 2, 4, 128>}, {transform_indices = @transform_1, window_bounds = array<i64: 2, 128>}]} {
    %c0 = arith.constant 0 : index
    %c0_0 = arith.constant 0 : index
    %c0_1 = arith.constant 0 : index
    %0 = vector.load %arg3[%c0, %c0_0, %c0_1] : memref<2x4x128xf32, #tpu.memory_space<vmem>>, vector<2x1x128xf32>
    %1 = vector.shape_cast %0 : vector<2x1x128xf32> to vector<2x128xf32>
    %c0_2 = arith.constant 0 : index
    %2 = memref.load %arg2[%c0_2] : memref<5xf32, #tpu.memory_space<smem>>
    %3 = vector.broadcast %2 : f32 to vector<2x128xf32>
    %4 = arith.mulf %1, %3 : vector<2x128xf32>
    %c0_3 = arith.constant 0 : index
    %c1 = arith.constant 1 : index
    %c0_4 = arith.constant 0 : index
    %5 = vector.load %arg3[%c0_3, %c1, %c0_4] : memref<2x4x128xf32, #tpu.memory_space<vmem>>, vector<2x1x128xf32>
    %6 = vector.shape_cast %5 : vector<2x1x128xf32> to vector<2x128xf32>
    %c1_5 = arith.constant 1 : index
    %7 = memref.load %arg2[%c1_5] : memref<5xf32, #tpu.memory_space<smem>>
    %8 = vector.broadcast %7 : f32 to vector<2x128xf32>
    %9 = arith.mulf %6, %8 : vector<2x128xf32>
    %10 = arith.addf %4, %9 : vector<2x128xf32>
    %c0_6 = arith.constant 0 : index
    %c2 = arith.constant 2 : index
    %c0_7 = arith.constant 0 : index
    %11 = vector.load %arg3[%c0_6, %c2, %c0_7] : memref<2x4x128xf32, #tpu.memory_space<vmem>>, vector<2x1x128xf32>
    %12 = vector.shape_cast %11 : vector<2x1x128xf32> to vector<2x128xf32>
    %c2_8 = arith.constant 2 : index
    %13 = memref.load %arg2[%c2_8] : memref<5xf32, #tpu.memory_space<smem>>
    %14 = vector.broadcast %13 : f32 to vector<2x128xf32>
    %15 = arith.mulf %12, %14 : vector<2x128xf32>
    %16 = arith.addf %10, %15 : vector<2x128xf32>
    %c0_9 = arith.constant 0 : index
    %c3 = arith.constant 3 : index
    %c0_10 = arith.constant 0 : index
    %17 = vector.load %arg3[%c0_9, %c3, %c0_10] : memref<2x4x128xf32, #tpu.memory_space<vmem>>, vector<2x1x128xf32>
    %18 = vector.shape_cast %17 : vector<2x1x128xf32> to vector<2x128xf32>
    %c3_11 = arith.constant 3 : index
    %19 = memref.load %arg2[%c3_11] : memref<5xf32, #tpu.memory_space<smem>>
    %20 = vector.broadcast %19 : f32 to vector<2x128xf32>
    %21 = arith.mulf %18, %20 : vector<2x128xf32>
    %22 = arith.addf %16, %21 : vector<2x128xf32>
    %c4 = arith.constant 4 : index
    %23 = memref.load %arg2[%c4] : memref<5xf32, #tpu.memory_space<smem>>
    %24 = vector.broadcast %23 : f32 to vector<2x128xf32>
    %25 = arith.addf %22, %24 : vector<2x128xf32>
    %c0_12 = arith.constant 0 : index
    %c0_13 = arith.constant 0 : index
    %26 = vector.load %arg4[%c0_12, %c0_13] : memref<2x128xf32, #tpu.memory_space<vmem>>, vector<2x128xf32>
    tpu.vector_store %arg4[%c0_12, %c0_13], %25 {strides = array<i32>} : memref<2x128xf32, #tpu.memory_space<vmem>>, vector<2x128xf32>,
    return
  }
  func.func @transform_0(%arg0: i32, %arg1: i32, %arg2: memref<5xf32, #tpu.memory_space<smem>>) -> (i32, i32, i32) {
    %c0_i32 = arith.constant 0 : i32
    %c0_i32_0 = arith.constant 0 : i32
    return %arg0, %c0_i32, %arg1 : i32, i32, i32
  }
  func.func @transform_1(%arg0: i32, %arg1: i32, %arg2: memref<5xf32, #tpu.memory_space<smem>>) -> (i32, i32) {
    %c0_i32 = arith.constant 0 : i32
    return %arg0, %arg1 : i32, i32
  }
}

</mosaic_0001>

<bundles_post_ra>
// kernel: tpu_custom_call.1
= control target key start
LH: loop header
LB: loop body
LE: loop exit
PB: predicated region body
PF: predicated region fallthrough
CT: control target
= control target key end

     0   :  { %s712_s0 = inlined_call_operand.hbm [shape: f32[5], index: 0, kind: input, shape index: {}]   ;;  %s713_s1 = inlined_call_operand.hbm [shape: f32[2,4,256], index: 1, kind: input, shape index: {}]   ;;  %s714_s2 = inlined_call_operand.hbm [shape: f32[2,256], index: 2, kind: output, shape index: {}]  }
   0x1   :  { %s381_s11 = scalar_lea.hbm %s712_s0, 16 }
   0x2   :  { %p382_p0 = scmp.ne.s32.totalorder %s712_s0, %s381_s11  ;;  %p385_p1 = scmp.lt.u32.totalorder %s381_s11, %s712_s0 }
   0x4   :  { %p387_p2 = pnand %p385_p1, %p382_p0 }
   0x6   :  { %390 = shalt.err (!%p387_p2)  }
   0x7   :  { %s507_s16 = smov [#allocation3]  }
   0x8   :  { %8 = dma.hbm_to_smem %s712_s0, 16, %s507_s16, [#allocation2] }
   0x9   :  { %473 = dma.done.wait [#allocation2], 16 }
   0xa   :  { %474 = vsyncadd [#allocation2], 4294967280 }
   0xb   :  { %10 = sfence }
   0xc   :  { %11 = vsyncpa [#allocation5], 0 }
   0xd   :  { %13 = vsyncpa [#allocation5 + $0x1], 0 }
   0xe   :  { %14 = vsyncpa [#allocation6], 0 }
   0xf   :  { %16 = vsyncpa [#allocation6 + $0x1], 0  ;;  %s540_s19 = smov 0   ;;  %s542_s20 = smov 0  }
  0x10   :  { %s544_s21 = smov 0   ;;  %s546_s22 = smov 0  }
  0x11   :  { %s548_s23 = smov 0   ;;  %s550_s24 = smov 0  }
  0x12 LB: > { %s298_s0 = sadd.s32 4294967295, %s505_s24   ;;  %s299_s25 = sadd.s32 4294967294, %s505_s24   ;;  %s505_s24 = sphi %s550_s24, %s22_s24   ;;  %s501_s23 = sphi %s548_s23, %s728_s23   ;;  %s497_s22 = sphi %s546_s22, %s727_s22   ;;  %s493_s21 = sphi %s544_s21, %s726_s21   ;;  %s489_s20 = sphi %s542_s20, %s725_s20   ;;  %s485_s19 = sphi %s540_s19, %s724_s19  }
  0x13   : > { %s31_s26 = sadd.s32 1, %s501_s23  ;;  %s43_s27 = sadd.s32 1, %s493_s21 }
  0x14   : > { %p32_p3 = scmp.ge.s32.totalorder %s31_s26, 2  ;;  %p50_p4 = scmp.ne.s32.totalorder %s493_s21, %s489_s20 }
  0x15   : > { %p51_p5 = scmp.eq.s32.totalorder %s505_s24, 0  ;;  %p56_p6 = scmp.ne.s32.totalorder %s489_s20, %s485_s19 }
  0x16   : > { %s730_s26 = smov (%p32_p3, %s31_s26), 0  ;;  %p57_p8 = scmp.eq.s32.totalorder %s298_s0, 0 }
  0x17   : > { %p581_p7 = por %p51_p5, %p50_p4  ;;  %s39_s29 = ssub.s32 %s501_s23, %s730_s26 }
  0x18   : > { %p82_p9 = scmp.eq.s32.totalorder %s298_s0, 1  ;;  %p41_p10 = scmp.eq.s32.totalorder %s39_s29, 0 }
  0x19   : > { %p587_p11 = por %p57_p8, %p56_p6  ;;  %p88_p13 = scmp.eq.s32.totalorder %s299_s25, 1 }
  0x1a   : > { %p591_p12 = por %p82_p9, %p50_p4  ;;  %p327_p2 = scmp.lt.s32.totalorder %s505_s24, 2 }
  0x1b   : > { %s596_s4 = scalar_select %p41_p10, %s493_s21, %s43_s27  }
  0x1c   : > { %s718_s3 = scalar_select %p591_p12, 1, 0 }
  0x1d   : > { %p598_p0 = por %p88_p13, %p56_p6  ;;  %s108_s6 = sand.u32 1, %s493_s21  }
  0x1e   : > { %s302_s7 = sshll.u32 %s108_s6, 3  ;;  %s303_s8 = sshll.u32 %s501_s23, 6 }
  0x1f   : > { %s719_s5 = scalar_select %p598_p0, 1, 0 }
  0x20   : > { %s609_s11 = scalar_lea.hbm %s713_s1, %s303_s8  ;;  %s112_s12 = scalar_lea.vmem [#allocation4], %s302_s7 }
  0x21   : > { %s121_s13 = sshll.u32 %s112_s12, 4  ;;  %p615_p3 = pnand %p327_p2, %p581_p7  ;;  %s611_s13 = int_to_ptr.vmem [resolvable:$true] %s121_s13 }
  0x22   : > { %s619_s15 = scalar_lea.sflag [#allocation5], %s108_s6  ;;  %s391_s16 = scalar_lea.hbm %s609_s11, 128 }
  0x23   : > { %p392_p4 = scmp.ne.s32.totalorder %s609_s11, %s391_s16  ;;  %p393_p5 = pneg %p615_p3 }
  0x24   : > { %s396_s0 = scalar_lea.hbm %s713_s1, 256  ;;  %p397_p7 = scmp.lt.u32.totalorder %s609_s11, %s713_s1 }
  0x25   : > { %p394_p6 = pnand %p393_p5, %p392_p4  ;;  %p398_p9 = scmp.lt.u32.totalorder %s396_s0, %s391_s16 }
  0x26   : > { %p400_p13 = scmp.lt.u32.totalorder %s391_s16, %s609_s11 }
  0x27   : > { %p395_p8 = pneg %p394_p6  ;;  %p399_p10 = por %p398_p9, %p397_p7 }
  0x29   : > { %p401_p2 = por %p400_p13, %p399_p10 }
  0x2b   : > { %p402_p1 = pnand %p401_p2, %p395_p8 }
  0x2d   : > { %405 = shalt.err (!%p402_p1)
}
  0x2e   : > { %s406_s28 = scalar_lea.vmem %s611_s13, 128  ;;  %s508_s29 = smov [#allocation4]  }
  0x2f   : > { %p407_p4 = scmp.ne.s32.totalorder %s611_s13, %s406_s28  ;;  %s411_s6 = sshll.u32 %s508_s29, 4  ;;  %s412_s6 = int_to_ptr.vmem [resolvable:$false] %s411_s6 }
  0x30   : > { %s413_s7 = scalar_lea.vmem %s412_s6, 256  ;;  %p414_p12 = scmp.lt.s32.totalorder %s611_s13, %s412_s6 }
  0x31   : > { %p409_p6 = pnand %p407_p4, %p393_p5  ;;  %p415_p7 = scmp.lt.s32.totalorder %s413_s7, %s406_s28 }
  0x33   : > { %p410_p0 = pneg %p409_p6  ;;  %p416_p9 = por %p415_p7, %p414_p12 }
  0x35   : > { %p417_p10 = pnand %p416_p9, %p410_p0 }
  0x37   : > { %420 = shalt.err (!%p417_p10)
}
  0x38   : > { %s509_s8 = smov 128   ;;  %s510_s9 = smov 64  }
  0x39   : > { %s511_s10 = smov 4   ;;  %p304_p1 = scmp.ge.s32.totalorder %s505_s24, 1 }
  0x3a   : > { %322 = dma.hbm_to_vmem [thread:$0]  (!%p615_p3), %s609_s11, 128, %s611_s13, %s619_s15, %s509_s8, %s510_s9, %s511_s10  }
  0x3b   : > { %p129_p5 = scmp.lt.s32.totalorder %s505_s24, 3 }
  0x3d   : > { %p130_p8 = pnand %p304_p1, %p129_p5 }
  0x3e   : > { %s650_s12 = sand.u32 (!%p130_p8), 1, %s489_s20  }
  0x3f   : > { %133 = sbr.rel (%p130_p8) target bundleno = 105 (0x69), region = 24  ;;  %s305_s16 = sshll.u32 (!%p130_p8), %s650_s12, 3 }
  0x40   : > { %s136_s17 = scalar_lea.sflag (!%p130_p8), [#allocation5], %s650_s12  ;;  %s139_s18 = scalar_lea.vmem (!%p130_p8), [#allocation4], %s305_s16 }
  0x46   : > { %476 = dma.done.wait (%p587_p11), %s136_s17, 128  }
  0x47   : > { %478 = vsyncadd (%p587_p11), %s136_s17, 4294967168  ;;  %s161_s14 = sld [smem:[#allocation3]]  ;;  %s307_s11 = sld [smem:[#allocation3 + $0x1]]  ;;  %v159_v0 = vld [vmem:[%s139_s18] sm:$0x1]  ;;  %vm196_vm0 = vcmask 1041409  }
  0x48   : > { %s308_s13 = sld [smem:[#allocation3 + $0x2]]  ;;  %s309_s15 = sld [smem:[#allocation3 + $0x3]]  ;;  %v160_v1 = vld [vmem:[%s139_s18 + $0x4] sm:$0x1]  ;;  %v165_v3 = vld [vmem:[%s139_s18 + $0x1] sm:$0x1] }
  0x49   : > { %s310_s0 = sld [smem:[#allocation3 + $0x4]]  ;;  %v166_v6 = vld [vmem:[%s139_s18 + $0x5] sm:$0x1]  ;;  %v173_v8 = vld [vmem:[%s139_s18 + $0x2] sm:$0x1]  ;;  %s306_s30 = sshll.u32 %s650_s12, 1 }
  0x4a   : > { %v174_v9 = vld [vmem:[%s139_s18 + $0x6] sm:$0x1]  ;;  %v181_v13 = vld [vmem:[%s139_s18 + $0x3] sm:$0x1]  ;;  %v182_v14 = vld [vmem:[%s139_s18 + $0x7] sm:$0x1] }
  0x4b   : > { %s157_s25 = scalar_lea.vmem [#allocation7], %s306_s30  ;;  %s312_s28 = sshll.u32 %s497_s22, 5 }
  0x4c   : > { %s216_s27 = sshll.u32 %s157_s25, 4  ;;  %s665_s7 = scalar_lea.hbm %s714_s2, %s312_s28  ;;  %s660_s27 = int_to_ptr.vmem [resolvable:$true] %s216_s27 }
  0x4d   : > { %v162_v2 = vstv %s161_s14  ;;  %v168_v7 = vstv %s307_s11  ;;  %s201_s8 = scalar_lea.sflag [#allocation6], %s650_s12  ;;  %s421_s9 = scalar_lea.vmem %s660_s27, 32 }
  0x4e   : > { %v163_v4 = vmul.f32 %v162_v2, %v159_v0  ;;  %v164_v5 = vmul.f32 %v162_v2, %v160_v1  ;;  %v169_v10 = vmul.f32 %v168_v7, %v165_v3  ;;  %v170_v11 = vmul.f32 %v168_v7, %v166_v6  ;;  %p422_p11 = scmp.ne.s32.totalorder %s660_s27, %s421_s9  ;;  %p721_p12 = scmp.ne.s32.totalorder %s718_s3, 0 }
  0x4f   : > { %v176_v12 = vstv %s308_s13  ;;  %v184_v15 = vstv %s309_s15  ;;  %v190_v24 = vstv %s310_s0  ;;  %s512_s22 = smov [#allocation7]  }
  0x50   : > { %v177_v16 = vmul.f32 %v176_v12, %v173_v8  ;;  %v178_v17 = vmul.f32 %v176_v12, %v174_v9  ;;  %v171_v18 = vadd.f32 %v169_v10, %v163_v4  ;;  %v172_v19 = vadd.f32 %v170_v11, %v164_v5  ;;  %p423_p0 = pnand %p422_p11, %p721_p12  ;;  %s425_s10 = sshll.u32 %s512_s22, 4  ;;  %s426_s10 = int_to_ptr.vmem [resolvable:$false] %s425_s10 }
  0x51   : > { %v185_v20 = vmul.f32 %v184_v15, %v181_v13  ;;  %v186_v21 = vmul.f32 %v184_v15, %v182_v14  ;;  %s427_s16 = scalar_lea.vmem %s426_s10, 64  ;;  %p428_p13 = scmp.lt.s32.totalorder %s660_s27, %s426_s10 }
  0x52   : > { %v179_v22 = vadd.f32 %v177_v16, %v171_v18  ;;  %v180_v23 = vadd.f32 %v178_v17, %v172_v19  ;;  %p424_p3 = pneg %p423_p0  ;;  %p429_p2 = scmp.lt.s32.totalorder %s427_s16, %s421_s9 }
  0x54   : > { %v187_v25 = vadd.f32 %v185_v20, %v179_v22  ;;  %v188_v26 = vadd.f32 %v186_v21, %v180_v23  ;;  %p430_p4 = por %p429_p2, %p428_p13 }
  0x56   : > { %v191_v27 = vadd.f32 %v190_v24, %v187_v25  ;;  %v192_v28 = vadd.f32 %v190_v24, %v188_v26  ;;  %p431_p6 = pnand %p430_p4, %p424_p3 }
  0x58   : > { %v195_v29 = vrot.slane %v192_v28, 7 }
  0x5a   : > { %v197_v30 = vsel %vm196_vm0, %v195_v29, %v191_v27 }
  0x5b   : > { %199 = vst [vmem:[%s157_s25] sm:$0x3] %v197_v30 }
  0x5c   : > { %434 = shalt.err (!%p431_p6)
}
  0x5d   : > { %s435_s12 = scalar_lea.hbm %s665_s7, 32  ;;  %s439_s14 = scalar_lea.hbm %s714_s2, 64 }
  0x5e   : > { %p436_p7 = scmp.ne.s32.totalorder %s665_s7, %s435_s12  ;;  %p440_p1 = scmp.lt.u32.totalorder %s665_s7, %s714_s2 }
  0x5f   : > { %p441_p5 = scmp.lt.u32.totalorder %s439_s14, %s435_s12  ;;  %p443_p11 = scmp.lt.u32.totalorder %s435_s12, %s665_s7 }
  0x60   : > { %p437_p9 = pnand %p436_p7, %p721_p12 }
  0x61   : > { %p442_p8 = por %p441_p5, %p440_p1 }
  0x62   : > { %p438_p10 = pneg %p437_p9 }
  0x63   : > { %p444_p0 = por %p443_p11, %p442_p8 }
  0x65   : > { %p445_p3 = pnand %p444_p0, %p438_p10 }
  0x67   : > { %448 = shalt.err (!%p445_p3)
}
  0x68   : > { %317 = dma.vmem_to_hbm [thread:$0]  (%p721_p12), %s660_s27, 32, %s665_s7, %s201_s8  }
  0x69 PF: > { %s228_s15 = sand.u32 1, %s485_s19   ;;  %p722_p13 = scmp.ne.s32.totalorder %s719_s5, 0 }
  0x6a   : > { %p723_p2 = scmp.ge.s32.totalorder %s505_s24, 2  ;;  %s229_s0 = scalar_lea.sflag [#allocation6], %s228_s15 }
  0x6c   : > { %p324_p4 = pnand %p723_p2, %p722_p13 }
  0x6e   : > { %480 = dma.done.wait (!%p324_p4), %s229_s0, 32  }
  0x6f   : > { %482 = vsyncadd (!%p324_p4), %s229_s0, 4294967264  ;;  %s22_s24 = sadd.s32 1, %s505_s24   ;;  %s724_s19 = smov %s489_s20 }
  0x70   : > { %p19_p6 = scmp.ge.s32.totalorder %s22_s24, 4   ;;  %s725_s20 = smov %s493_s21 }
  0x71   : > { %s726_s21 = smov %s596_s4  ;;  %s727_s22 = smov %s501_s23 }
  0x72   : > { %s728_s23 = smov %s730_s26  ;;  %21 = sbr.rel (!%p19_p6) target bundleno = 18 (0x12), region = 69 }
  0x79   :  { %234 = vsyncpa [#allocation5], 1 }
  0x7a   :  { %236 = vsyncpa [#allocation5 + $0x1], 1 }
  0x7b   :  { %237 = vsyncpa [#allocation6], 1 }
  0x7c   :  { %239 = vsyncpa [#allocation6 + $0x1], 1 }

</bundles_post_ra>
